<compile_context>
chip_gen: v5e
topology: v5e:2x2
jax: 0.10.0
libtpu: 0.0.40
codegen_flags: <defaults>
</compile_context>

<pallas_src>
import jax
import jax.numpy as jnp
from jax.experimental import pallas as pl
from jax.experimental.pallas import tpu as pltpu


def _copy_kernel(x_ref, o_ref):
    # Identity: the output tile is exactly the input tile.
    o_ref[...] = x_ref[...]


_LANE_CHOICES = (2048, 1024, 512, 256, 128)
_MAX_BLOCK_BYTES = 4 * 1024 * 1024  # 4 MiB/block -> <=16 MiB w/ double-buffered in+out


def _pick_lanes(total):
    for lanes in _LANE_CHOICES:
        if total % lanes == 0:
            return lanes
    return None


def _pick_block_rows(rows, lanes, itemsize):
    """Largest row-block that is a multiple of 8, divides `rows`, and fits the
    per-block VMEM budget.  Full-dim (== rows) is always a legal fallback."""
    max_rows = max(8, _MAX_BLOCK_BYTES // (lanes * itemsize))
    if rows <= max_rows:
        return rows
    br = (min(max_rows, rows) // 8) * 8
    while br >= 8:
        if rows % br == 0:
            return br
        br -= 8
    return rows  # no clean divisor; single full-dim block (rare)


def identity(x):
    """Identity forward: returns a tensor equal to x (same shape & dtype).

    NOTE: outside of a kernel-benchmarking context the optimal implementation
    is simply `return x` (zero ops, no fusion barrier).  This wrapper keeps a
    Pallas custom call as required and makes the unavoidable copy run at HBM
    roofline.
    """
    total = x.size
    if total == 0:
        return x

    itemsize = jnp.dtype(x.dtype).itemsize
    lanes = _pick_lanes(total)

    if lanes is None:
        # Shape not a multiple of 128 elements: copy the whole array as one
        # block (block_shape == full array dims is always legal).
        return pl.pallas_call(
            _copy_kernel,
            out_shape=jax.ShapeDtypeStruct(x.shape, x.dtype),
            cost_estimate=pl.CostEstimate(
                flops=0, transcendentals=0, bytes_accessed=2 * total * itemsize
            ),
        )(x)

    rows = total // lanes
    x2 = x.reshape(rows, lanes)  # contiguous view; no extra HBM pass
    block_rows = _pick_block_rows(rows, lanes, itemsize)
    grid = (rows // block_rows,)

    out2 = pl.pallas_call(
        _copy_kernel,
        out_shape=jax.ShapeDtypeStruct((rows, lanes), x.dtype),
        grid=grid,
        in_specs=[pl.BlockSpec((block_rows, lanes), lambda i: (i, 0))],
        out_specs=pl.BlockSpec((block_rows, lanes), lambda i: (i, 0)),
        compiler_params=pltpu.CompilerParams(
            # Pure data-parallel copy: shard the grid across TensorCores (v7x).
            dimension_semantics=("parallel",),
            # Headroom above v5e's 16 MiB scoped default; well under v7x's
            # 64 MiB physical VMEM.
            vmem_limit_bytes=32 * 1024 * 1024,
        ),
        cost_estimate=pl.CostEstimate(
            flops=0, transcendentals=0, bytes_accessed=2 * total * itemsize
        ),
    )(x2)
    return out2.reshape(x.shape)


if __name__ == "__main__":
    key = jax.random.PRNGKey(0)
    x = jax.random.normal(key, (2, 4, 16, 16), dtype=jnp.float32)  # NCHW
    y = identity(x)
    y = jax.block_until_ready(y)
    assert y.shape == x.shape and y.dtype == x.dtype
    assert bool(jnp.all(y == x))
    print("KERNEL_OK")
</pallas_src>

<mosaic_0001>
module attributes {stable_mosaic.version = 11 : i64} {
  func.func @_copy_kernel(%arg0: i32, %arg1: memref<1x2048xf32, #tpu.memory_space<vmem>>, %arg2: memref<1x2048xf32, #tpu.memory_space<vmem>>) attributes {dimension_semantics = [#tpu.dimension_semantics<parallel>], iteration_bounds = array<i64: 1>, scalar_prefetch = 0 : i64, scratch_operands = 0 : i64, tpu.core_type = #tpu.core_type<tc>, window_params = [{transform_indices = @transform_0, window_bounds = array<i64: 1, 2048>}, {transform_indices = @transform_1, window_bounds = array<i64: 1, 2048>}]} {
    %c0 = arith.constant 0 : index
    %c0_0 = arith.constant 0 : index
    %0 = vector.load %arg1[%c0, %c0_0] : memref<1x2048xf32, #tpu.memory_space<vmem>>, vector<1x2048xf32>
    %c0_1 = arith.constant 0 : index
    %c0_2 = arith.constant 0 : index
    %1 = vector.load %arg2[%c0_1, %c0_2] : memref<1x2048xf32, #tpu.memory_space<vmem>>, vector<1x2048xf32>
    tpu.vector_store %arg2[%c0_1, %c0_2], %0 {strides = array<i32>} : memref<1x2048xf32, #tpu.memory_space<vmem>>, vector<1x2048xf32>,
    return
  }
  func.func @transform_0(%arg0: i32) -> (i32, i32) {
    %c0_i32 = arith.constant 0 : i32
    %c0_i32_0 = arith.constant 0 : i32
    return %arg0, %c0_i32 : i32, i32
  }
  func.func @transform_1(%arg0: i32) -> (i32, i32) {
    %c0_i32 = arith.constant 0 : i32
    %c0_i32_0 = arith.constant 0 : i32
    return %arg0, %c0_i32 : i32, i32
  }
}

</mosaic_0001>

<bundles_post_ra>
// kernel: tpu_custom_call.1
= control target key start
LH: loop header
LB: loop body
LE: loop exit
PB: predicated region body
PF: predicated region fallthrough
CT: control target
= control target key end

     0   :  { %6 = vsyncpa [#allocation3], 0  ;;  %s116_s0 = inlined_call_operand.hbm [shape: f32[1,2048], index: 0, kind: input, shape index: {}]   ;;  %s117_s1 = inlined_call_operand.hbm [shape: f32[1,2048], index: 1, kind: output, shape index: {}]  }
   0x1   :  { %7 = vsyncpa [#allocation4], 0  ;;  %s13_s8 = sshll.u32 %s116_s0, 4  ;;  %s98_s9 = smov [#allocation2]   ;;  %s14_s8 = int_to_ptr.hbm [resolvable:$true] %s13_s8 }
   0x2   :  { %s15_s10 = sshll.u32 %s98_s9, 4  ;;  %s16_s10 = int_to_ptr.vmem [resolvable:$true] %s15_s10 }
   0x3   :  { %18 = dma.hbm_to_vmem [thread:$0]  %s14_s8, 256, %s16_s10, [#allocation3]  }
   0x4   :  { %94 = dma.done.wait [#allocation3], 256  }
   0x5   :  { %95 = vsyncadd [#allocation3], 4294967040  ;;  %s99_s11 = smov [#allocation5]   ;;  %s34_s15 = sshll.u32 %s117_s1, 4  ;;  %v23_v0 = vld [vmem:[#allocation2] sm:$0xff]  ;;  %v24_v1 = vld [vmem:[#allocation2 + $0x8] sm:$0xff]  ;;  %s35_s15 = int_to_ptr.hbm [resolvable:$true] %s34_s15 }
   0x6   :  { %s32_s12 = sshll.u32 %s99_s11, 4  ;;  %25 = vst [vmem:[#allocation5] sm:$0xff] %v23_v0  ;;  %s33_s12 = int_to_ptr.vmem [resolvable:$true] %s32_s12 }
   0x7   :  { %26 = vst [vmem:[#allocation5 + $0x8] sm:$0xff] %v24_v1 }
   0x8   :  { %37 = dma.vmem_to_hbm [thread:$0]  %s33_s12, 256, %s35_s15, [#allocation4]  }
   0x9   :  { %96 = dma.done.wait [#allocation4], 256  }
   0xa   :  { %97 = vsyncadd [#allocation4], 4294967040 }
   0xb   :  { %42 = vsyncpa [#allocation3], 1 }
   0xc   :  { %43 = vsyncpa [#allocation4], 1 }

</bundles_post_ra>
